<compile_context>
chip_gen: v7x
topology: tpu7x:2x2x1
jax: 0.10.0
libtpu: 0.0.40
codegen_flags: <defaults>
</compile_context>

<pallas_src>
import functools
import math

import jax
import jax.numpy as jnp
from jax import lax
from jax.experimental import pallas as pl
from jax.experimental.pallas import tpu as pltpu

INF = 1e20
_MARKOFF = -INF


# ----------------------------------------------------------------------------
# Generation-aware configuration
# ----------------------------------------------------------------------------
def _tpu_vmem_capacity_bytes():
    try:
        info = pltpu.get_tpu_info()
        cap = getattr(info, "vmem_capacity_bytes", None)
        if cap:
            return int(cap)
    except Exception:
        pass
    return 128 * 1024 * 1024  # v5e/v6e default


@functools.lru_cache(maxsize=None)
def _vmem_budget_bytes():
    cap = _tpu_vmem_capacity_bytes()
    # ~40 MiB on v7x (64 MiB/TC), ~80 MiB on v5e/v6e (128 MiB), never above 96 MiB.
    return min(cap * 5 // 8, 96 * 1024 * 1024)


@functools.lru_cache(maxsize=None)
def _single_block_n_cap():
    # Per review: cap the full-N single-block path ~1k on v7x, ~2k on v5e/v6e.
    return 1024 if _tpu_vmem_capacity_bytes() <= 64 * 1024 * 1024 else 2048


def _single_block_bytes(N, D, PH):
    ctx = 2 * N * D * 4                    # ctx block, double-buffered f32
    w = 2 * D * PH * 2                     # bf16 weights (conservatively x2)
    out = 2 * N * N * 4                    # output block, double-buffered f32
    interm = N * D * 2 + N * PH * 6 + N * N * 4
    return ctx + w + out + interm


_TILE_CANDIDATES = (512, 256, 128)         # multiples of 128 (lane/MXU dense)


def _tiled_step_bytes(tn, D, PH):
    ctx = 2 * 2 * tn * D * 4               # two ctx blocks, double-buffered f32
    w = 2 * D * PH * 2
    out = 2 * tn * tn * 4
    scratch = tn * PH * 2                  # hoisted hi (bf16)
    interm = tn * D * 2 + tn * PH * 6 + tn * tn * 4
    return ctx + w + out + scratch + interm


def _pick_tile_n(N, D, PH, budget):
    fit = [t for t in _TILE_CANDIDATES
           if _tiled_step_bytes(t, D, PH) <= int(budget * 0.6)]
    if not fit:
        fit = [128]
    # Prefer the largest fitting tile that divides N -> no pad-then-slice.
    for t in fit:
        if N % t == 0:
            return t
    return fit[0]


# ----------------------------------------------------------------------------
# Kernels
# ----------------------------------------------------------------------------
def _postprocess(att, mask_i, mask_j, epsilon):
    """Fused ctx-mask (row (ti,1) x col (1,tj), no transpose) + epsilon threshold."""
    if mask_i is not None:
        valid = mask_i * mask_j                       # (ti,1)*(1,tj) -> (ti,tj)
        att = jnp.where(valid > 0.5, att, _MARKOFF)
    if epsilon is not None:
        att = jnp.where(att > epsilon, att, _MARKOFF)
    return att


def _gram_kernel_single(*refs, epsilon, has_mask):
    """grid = (B,). Whole (N, N) attention for one batch; h computed once."""
    if has_mask:
        ctx_ref, w_ref, mrow_ref, mcol_ref, out_ref = refs
    else:
        ctx_ref, w_ref, out_ref = refs
        mrow_ref = mcol_ref = None

    x = ctx_ref[0].astype(jnp.bfloat16)               # (N, D)
    w = w_ref[...]                                    # (D, PH) bf16, VMEM-resident
    # relu in f32 (v5e VPU has no bf16 elementwise), cast h to bf16 for the MXU.
    h = jnp.maximum(jnp.dot(x, w, preferred_element_type=jnp.float32), 0.0)
    h = h.astype(jnp.bfloat16)                        # (N, PH)
    gram = lax.dot_general(h, h, (((1,), (1,)), ((), ())),
                           preferred_element_type=jnp.float32)   # (N, N) = h @ h^T

    mi = mrow_ref[0] if has_mask else None            # (N, 1)
    mj = mcol_ref[0] if has_mask else None            # (1, N)
    out_ref[0] = _postprocess(gram, mi, mj, epsilon).astype(out_ref.dtype)


def _gram_kernel_tiled(*refs, epsilon, has_mask):
    """grid = (B, Ni, Nj). One (tn, tn) tile per step; hi hoisted out of the j sweep."""
    if has_mask:
        ctx_i_ref, ctx_j_ref, w_ref, mrow_ref, mcol_ref, out_ref, hi_ref = refs
    else:
        ctx_i_ref, ctx_j_ref, w_ref, out_ref, hi_ref = refs
        mrow_ref = mcol_ref = None

    w = w_ref[...]                                    # (D, PH) bf16

    # hi projection only once per (b, i) row sweep (j axis is "arbitrary", so it
    # runs sequentially on one core and the VMEM scratch carries across j steps).
    @pl.when(pl.program_id(2) == 0)
    def _():
        xi = ctx_i_ref[0].astype(jnp.bfloat16)        # (tn, D)
        hi = jnp.maximum(jnp.dot(xi, w, preferred_element_type=jnp.float32), 0.0)
        hi_ref[...] = hi.astype(jnp.bfloat16)

    xj = ctx_j_ref[0].astype(jnp.bfloat16)            # (tn, D)
    hj = jnp.maximum(jnp.dot(xj, w, preferred_element_type=jnp.float32), 0.0)
    hj = hj.astype(jnp.bfloat16)
    gram = lax.dot_general(hi_ref[...], hj, (((1,), (1,)), ((), ())),
                           preferred_element_type=jnp.float32)   # (tn, tn)

    mi = mrow_ref[0] if has_mask else None            # (tn, 1)
    mj = mcol_ref[0] if has_mask else None            # (1, tn)
    out_ref[0] = _postprocess(gram, mi, mj, epsilon).astype(out_ref.dtype)


# ----------------------------------------------------------------------------
# Wrappers
# ----------------------------------------------------------------------------
def prepare_weights(weights, lane_multiple=128):
    """One-time (parameter-init-time) layout transform.

    weights: (P, H, D) stack of nn.Linear weights (PyTorch layout).
    Returns W_all of shape (D, PH) bf16, PH padded to a multiple of `lane_multiple`
    with zero columns, pre-scaled by sqrt(1/P) so the 1/P mean is free:
      relu(X @ (s W)) @ relu(X @ (s W))^T == s^2 * relu(X@W) @ relu(X@W)^T.
    """
    P, H, D = weights.shape
    scale = 1.0 / math.sqrt(float(P))
    w_all = jnp.transpose(weights, (2, 0, 1)).reshape(D, P * H) * scale
    pad = (-(P * H)) % lane_multiple
    if pad:
        w_all = jnp.pad(w_all, ((0, 0), (0, pad)))
    return w_all.astype(jnp.bfloat16)


def graph_learner_attention(context, w_all, ctx_mask=None, epsilon=None,
                            tile_n=None, out_dtype=jnp.float32):
    """context: (B, N, D) f32; w_all: (D, PH) bf16 (from prepare_weights)."""
    B, N, D = context.shape
    PH = w_all.shape[1]
    has_mask = ctx_mask is not None
    budget = _vmem_budget_bytes()

    if has_mask:
        mrow = ctx_mask.astype(jnp.float32).reshape(B, N, 1)   # sublane-major (i side)
        mcol = ctx_mask.astype(jnp.float32).reshape(B, 1, N)   # lane-major   (j side)

    if tile_n is None:
        use_single = (N <= _single_block_n_cap()
                      and _single_block_bytes(N, D, PH) <= int(budget * 0.6))
    else:
        use_single = tile_n >= N

    if use_single:
        # ---- single-block path: one full (N, N) block per batch, h computed once.
        # (For tiny N — e.g. N < 64 — plain XLA fusion would win; the kernel is
        #  kept so every shape goes through the same fused mask/epsilon path.)
        kernel = functools.partial(_gram_kernel_single,
                                   epsilon=epsilon, has_mask=has_mask)
        in_specs = [pl.BlockSpec((1, N, D), lambda b: (b, 0, 0)),
                    pl.BlockSpec((D, PH), lambda b: (0, 0))]
        args = [context, w_all]
        if has_mask:
            in_specs += [pl.BlockSpec((1, N, 1), lambda b: (b, 0, 0)),
                         pl.BlockSpec((1, 1, N), lambda b: (b, 0, 0))]
            args += [mrow, mcol]
        return pl.pallas_call(
            kernel,
            out_shape=jax.ShapeDtypeStruct((B, N, N), out_dtype),
            grid_spec=pltpu.PrefetchScalarGridSpec(
                num_scalar_prefetch=0,
                grid=(B,),
                in_specs=in_specs,
                out_specs=pl.BlockSpec((1, N, N), lambda b: (b, 0, 0)),
            ),
            compiler_params=pltpu.CompilerParams(
                dimension_semantics=("parallel",),
                vmem_limit_bytes=budget),
        )(*args)

    # ---- tiled path: (B, Ni, Nj) grid, hi hoisted across the j sweep --------
    tn = tile_n if tile_n is not None else _pick_tile_n(N, D, PH, budget)
    n_pad = (-N) % tn          # 0 whenever tn divides N (preferred by _pick_tile_n)
    N_p = N + n_pad
    ctx_p, mrow_p, mcol_p = context, None, None
    if n_pad:
        ctx_p = jnp.pad(context, ((0, 0), (0, n_pad), (0, 0)))
    if has_mask:
        mrow_p = jnp.pad(mrow, ((0, 0), (0, n_pad), (0, 0))) if n_pad else mrow
        mcol_p = jnp.pad(mcol, ((0, 0), (0, 0), (0, n_pad))) if n_pad else mcol
    nt = N_p // tn

    kernel = functools.partial(_gram_kernel_tiled,
                               epsilon=epsilon, has_mask=has_mask)
    in_specs = [pl.BlockSpec((1, tn, D), lambda b, i, j: (b, i, 0)),
                pl.BlockSpec((1, tn, D), lambda b, i, j: (b, j, 0)),
                pl.BlockSpec((D, PH), lambda b, i, j: (0, 0))]
    args = [ctx_p, ctx_p, w_all]
    if has_mask:
        in_specs += [pl.BlockSpec((1, tn, 1), lambda b, i, j: (b, i, 0)),
                     pl.BlockSpec((1, 1, tn), lambda b, i, j: (b, 0, j))]
        args += [mrow_p, mcol_p]

    out = pl.pallas_call(
        kernel,
        out_shape=jax.ShapeDtypeStruct((B, N_p, N_p), out_dtype),
        grid_spec=pltpu.PrefetchScalarGridSpec(
            num_scalar_prefetch=0,
            grid=(B, nt, nt),
            in_specs=in_specs,
            out_specs=pl.BlockSpec((1, tn, tn), lambda b, i, j: (b, i, j)),
            scratch_shapes=[pltpu.VMEM((tn, PH), jnp.bfloat16)],
        ),
        # j axis "arbitrary": the hi scratch carries across the j sweep.
        compiler_params=pltpu.CompilerParams(
            dimension_semantics=("parallel", "parallel", "arbitrary"),
            vmem_limit_bytes=budget),
    )(*args)
    if n_pad:
        out = out[:, :N, :N]
    return out


def graph_learner_forward(context, w_all, ctx_mask=None, epsilon=None,
                          topk=None, tile_n=None):
    """Full forward of the 'attention' metric (mask/epsilon fused into the kernel)."""
    attention = graph_learner_attention(context, w_all, ctx_mask=ctx_mask,
                                        epsilon=epsilon, tile_n=tile_n)
    # TODO(synk): topk (build_knn_neighbourhood) scatter not implemented in-kernel.
    return attention


# ----------------------------------------------------------------------------
# Pure-JAX f32 reference (mirrors the PyTorch loop over perspectives)
# ----------------------------------------------------------------------------
def _reference(context, weights):
    P = weights.shape[0]
    acc = 0.0
    for p in range(P):
        h = jax.nn.relu(context @ weights[p].T)
        acc = acc + h @ jnp.swapaxes(h, -1, -2)
    return acc / P


if __name__ == "__main__":
    key = jax.random.PRNGKey(0)
    B, N, D, H, P = 2, 8, 32, 32, 16  # batch, ctx_size, input_size, hidden_size, num_pers

    k1, k2, k3, k4, k5, k6 = jax.random.split(key, 6)
    context = jax.random.normal(k1, (B, N, D), dtype=jnp.float32)
    limit = math.sqrt(6.0 / (D + H))
    weights = jax.random.uniform(k2, (P, H, D), dtype=jnp.float32,
                                 minval=-limit, maxval=limit)

    # One-time weight preparation (layout + sqrt(1/P) fold + lane pad + bf16).
    w_all = prepare_weights(weights)

    # 1) small-N single-block path vs f32 reference (bf16 MXU => loosened tolerance).
    out = jax.block_until_ready(graph_learner_forward(context, w_all))
    ref = _reference(context, weights)
    assert out.shape == (B, N, N)
    assert jnp.allclose(out, ref, atol=5e-2, rtol=5e-2), "small-N mismatch vs reference"

    # 2) fused ctx_mask + epsilon path: must match applying the post-processing
    #    in plain JAX to the kernel's own unmasked attention.
    mask = (jax.random.uniform(k3, (B, N)) > 0.3).astype(jnp.float32)
    eps = 0.5
    out_fused = jax.block_until_ready(
        graph_learner_forward(context, w_all, ctx_mask=mask, epsilon=eps))
    m = mask.astype(bool)
    ref_fused = jnp.where(m[:, None, :], out, _MARKOFF)
    ref_fused = jnp.where(m[:, :, None], ref_fused, _MARKOFF)
    ref_fused = jnp.where(ref_fused > eps, ref_fused, _MARKOFF)
    assert jnp.allclose(out_fused, ref_fused), "fused mask/epsilon mismatch"

    # 3) tiled path (forced tile_n=128, 128 | 256 so no padding): validates the
    #    (B, Ni, Nj) grid + hoisted-hi scratch.
    N2 = 256
    context2 = jax.random.normal(k4, (1, N2, D), dtype=jnp.float32)
    out2 = jax.block_until_ready(graph_learner_forward(context2, w_all, tile_n=128))
    ref2 = _reference(context2, weights)
    assert out2.shape == (1, N2, N2)
    assert jnp.allclose(out2, ref2, atol=5e-2, rtol=5e-2), "tiled-N mismatch vs reference"

    # 4) padded tiled fallback (N=192 not a multiple of 128) + fused mask/epsilon.
    N3 = 192
    context3 = jax.random.normal(k5, (1, N3, D), dtype=jnp.float32)
    mask3 = (jax.random.uniform(k6, (1, N3)) > 0.3).astype(jnp.float32)
    out3_plain = jax.block_until_ready(
        graph_learner_forward(context3, w_all, tile_n=128))
    out3_fused = jax.block_until_ready(
        graph_learner_forward(context3, w_all, ctx_mask=mask3, epsilon=eps, tile_n=128))
    ref3 = _reference(context3, weights)
    assert out3_plain.shape == (1, N3, N3)
    assert jnp.allclose(out3_plain, ref3, atol=5e-2, rtol=5e-2), "padded tiled mismatch"
    m3 = mask3.astype(bool)
    ref3_fused = jnp.where(m3[:, None, :], out3_plain, _MARKOFF)
    ref3_fused = jnp.where(m3[:, :, None], ref3_fused, _MARKOFF)
    ref3_fused = jnp.where(ref3_fused > eps, ref3_fused, _MARKOFF)
    assert jnp.allclose(out3_fused, ref3_fused), "padded fused mask/epsilon mismatch"

    print("KERNEL_OK")
</pallas_src>

<mosaic_0001>
module attributes {stable_mosaic.version = 11 : i64} {
  func.func @_gram_kernel_single(%arg0: i32, %arg1: memref<1x8x32xf32, #tpu.memory_space<vmem>>, %arg2: memref<32x512xbf16, #tpu.memory_space<vmem>>, %arg3: memref<1x8x8xf32, #tpu.memory_space<vmem>>) attributes {dimension_semantics = [#tpu.dimension_semantics<parallel>], iteration_bounds = array<i64: 2>, scalar_prefetch = 0 : i64, scratch_operands = 0 : i64, tpu.core_type = #tpu.core_type<tc>, window_params = [{transform_indices = @transform_0, window_bounds = array<i64: 1, 8, 32>}, {pipeline_mode = #tpu.pipeline_mode<synchronous>, transform_indices = @transform_1, window_bounds = array<i64: 32, 512>}, {transform_indices = @transform_2, window_bounds = array<i64: 1, 8, 8>}]} {
    %c0 = arith.constant 0 : index
    %c0_0 = arith.constant 0 : index
    %c0_1 = arith.constant 0 : index
    %0 = vector.load %arg1[%c0, %c0_0, %c0_1] : memref<1x8x32xf32, #tpu.memory_space<vmem>>, vector<1x8x32xf32>
    %1 = vector.shape_cast %0 : vector<1x8x32xf32> to vector<8x32xf32>
    %2 = arith.truncf %1 : vector<8x32xf32> to vector<8x32xbf16>
    %c0_2 = arith.constant 0 : index
    %c0_3 = arith.constant 0 : index
    %3 = vector.load %arg2[%c0_2, %c0_3] : memref<32x512xbf16, #tpu.memory_space<vmem>>, vector<32x512xbf16>
    %cst = arith.constant dense<0.000000e+00> : vector<8x512xf32>
    %4 = tpu.matmul %2, %3, %cst {dimension_numbers = #tpu.dot_dimension_numbers<[1], [0], [0], [1], [0, 0, 1, 1], [], []>} : vector<8x32xbf16>, vector<32x512xbf16>, vector<8x512xf32> -> vector<8x512xf32>
    %cst_4 = arith.constant 0.000000e+00 : f32
    %5 = vector.broadcast %cst_4 : f32 to vector<8x512xf32>
    %6 = arith.maximumf %4, %5 : vector<8x512xf32>
    %7 = arith.truncf %6 : vector<8x512xf32> to vector<8x512xbf16>
    %cst_5 = arith.constant dense<0.000000e+00> : vector<8x8xf32>
    %8 = tpu.matmul %7, %7, %cst_5 {dimension_numbers = #tpu.dot_dimension_numbers<[1], [1], [0], [0], [0, 0, 1, 0], [], []>} : vector<8x512xbf16>, vector<8x512xbf16>, vector<8x8xf32> -> vector<8x8xf32>
    %c0_6 = arith.constant 0 : index
    %c0_7 = arith.constant 0 : index
    %c0_8 = arith.constant 0 : index
    %9 = vector.load %arg3[%c0_6, %c0_7, %c0_8] : memref<1x8x8xf32, #tpu.memory_space<vmem>>, vector<1x8x8xf32>
    %10 = vector.shape_cast %9 : vector<1x8x8xf32> to vector<8x8xf32>
    %11 = vector.shape_cast %8 : vector<8x8xf32> to vector<1x8x8xf32>
    tpu.vector_store %arg3[%c0_6, %c0_7, %c0_8], %11 {strides = array<i32>} : memref<1x8x8xf32, #tpu.memory_space<vmem>>, vector<1x8x8xf32>,
    return
  }
  func.func @transform_0(%arg0: i32) -> (i32, i32, i32) {
    %c0_i32 = arith.constant 0 : i32
    %c0_i32_0 = arith.constant 0 : i32
    %c0_i32_1 = arith.constant 0 : i32
    return %arg0, %c0_i32, %c0_i32_0 : i32, i32, i32
  }
  func.func @transform_1(%arg0: i32) -> (i32, i32) {
    %c0_i32 = arith.constant 0 : i32
    %c0_i32_0 = arith.constant 0 : i32
    %c0_i32_1 = arith.constant 0 : i32
    return %c0_i32, %c0_i32_0 : i32, i32
  }
  func.func @transform_2(%arg0: i32) -> (i32, i32, i32) {
    %c0_i32 = arith.constant 0 : i32
    %c0_i32_0 = arith.constant 0 : i32
    %c0_i32_1 = arith.constant 0 : i32
    return %arg0, %c0_i32, %c0_i32_0 : i32, i32, i32
  }
}

</mosaic_0001>

<bundles_post_ra>
// kernel: tpu_custom_call.1
= control target key start
LH: loop header
LB: loop body
LE: loop exit
PB: predicated region body
PF: predicated region fallthrough
CT: control target
= control target key end

     0   :  { %7 = vsyncpa [#allocation3], 0  ;;  %s946_s0 = inlined_call_operand.hbm [shape: f32[2,8,32], index: 0, kind: input, shape index: {}]   ;;  %s947_s1 = inlined_call_operand.hbm [shape: bf16[32,512], index: 1, kind: input, shape index: {}]   ;;  %s948_s2 = inlined_call_operand.hbm [shape: f32[2,8,8], index: 2, kind: output, shape index: {}]  }
   0x1   :  { %9 = vsyncpa [#allocation3 + $0x1], 0 }
   0x2   :  { %10 = vsyncpa [#allocation6], 0 }
   0x3   :  { %11 = vsyncpa [#allocation4], 0 }
   0x4   :  { %13 = vsyncpa [#allocation4 + $0x1], 0  ;;  %s746_s9 = smov 0   ;;  %s748_s10 = smov 0  }
   0x5   :  { %s750_s11 = smov 0   ;;  %s752_s12 = smov 0  }
   0x6 LB: > { %s767_s13 = sadd.s32 4294967295, %s723_s12   ;;  %s495_s14 = sadd.s32 4294967294, %s723_s12   ;;  %s723_s12 = sphi %s752_s12, %s968_s12   ;;  %s719_s11 = sphi %s750_s11, %s967_s11   ;;  %s715_s10 = sphi %s748_s10, %s966_s10   ;;  %s711_s9 = sphi %s746_s9, %s965_s9  }
   0x7   : > { %p39_p0 = scmp.ne.s32.totalorder %s715_s10, %s711_s9  ;;  %p949_p1 = scmp.eq.s32.totalorder %s767_s13, 0 }
   0x8   : > { %p90_p3 = scmp.eq.s32.totalorder %s495_s14, 1  ;;  %p496_p5 = scmp.ge.s32.totalorder %s723_s12, 1 }
   0x9   : > { %p776_p4 = por %p949_p1, %p39_p0  ;;  %p97_p7 = scmp.lt.s32.totalorder %s723_s12, 3 }
   0xa   : > { %p781_p6 = por %p90_p3, %p39_p0  ;;  %s725_s18 = smov [#allocation5]  }
   0xb   : > { %s952_s15 = scalar_select %p776_p4, 1, 0 }
   0xc   : > { %s953_s16 = scalar_select %p781_p6, 1, 0 }
   0xd   : > { %p786_p8 = pnand %p496_p5, %p97_p7  ;;  %s109_s19 = sshll.u32 %s725_s18, 4  ;;  %s790_s19 = int_to_ptr.vmem [resolvable:$true] %s109_s19 }
   0xe   : > { %s802_s21 = sadd.s32 1, %s723_s12   ;;  %s26_s22 = sadd.s32 1, %s719_s11 }
   0xf   : > { %s954_s17 = scalar_select %p786_p8, 1, 0 }
  0x10   : > { %p531_p9 = pneg %p786_p8  ;;  %s23_s23 = ssub.s32 %s723_s12, %s802_s21 }
  0x11   : > { %s595_s26 = scalar_lea.hbm %s947_s1, 1024 }
  0x12   : > { %p797_p11 = pnand %p531_p9, %p949_p1  ;;  %p596_p12 = scmp.ne.s32.totalorder %s947_s1, %s595_s26 }
  0x13   : > { %p602_p5 = scmp.lt.u32.totalorder %s595_s26, %s947_s1 }
  0x14   : > { %p597_p13 = pneg %p797_p11 }
  0x16   : > { %p598_p0 = pnand %p597_p13, %p596_p12 }
  0x18   : > { %p599_p3 = pneg %p598_p0 }
  0x1a   : > { %p604_p7 = pnand %p602_p5, %p599_p3 }
  0x1c   : > { %607 = shalt.err (!%p604_p7)
}
  0x1d   : > { %s608_s3 = scalar_lea.vmem %s790_s19, 1024  ;;  %p616_p2 = scmp.lt.s32.totalorder %s790_s19, %s790_s19 }
  0x1e   : > { %p609_p9 = scmp.ne.s32.totalorder %s790_s19, %s608_s3  ;;  %p617_p6 = scmp.lt.s32.totalorder %s608_s3, %s608_s3 }
  0x20   : > { %p611_p10 = pnand %p609_p9, %p597_p13  ;;  %p618_p4 = por %p617_p6, %p616_p2 }
  0x22   : > { %p612_p1 = pneg %p611_p10 }
  0x24   : > { %p619_p8 = pnand %p618_p4, %p612_p1 }
  0x26   : > { %622 = shalt.err (!%p619_p8)
}
  0x27   : > { %s726_s4 = smov 256   ;;  %s727_s5 = smov 16  }
  0x28   : > { %534 = dma.hbm_to_vmem [thread:$0]  (!%p797_p11), %s947_s1, 1024, %s790_s19, [#allocation6], %s726_s4, %s726_s4, %s727_s5  }
  0x29   : > { %p24_p2 = scmp.eq.s32.totalorder %s23_s23, 0  ;;  %p33_p1 = scmp.ne.s32.totalorder %s719_s11, %s715_s10 }
  0x2a   : > { %p34_p4 = scmp.eq.s32.totalorder %s723_s12, 0  ;;  %p544_p6 = scmp.lt.s32.totalorder %s723_s12, 2 }
  0x2b   : > { %s833_s8 = scalar_select %p24_p2, %s719_s11, %s26_s22  }
  0x2c   : > { %p35_p8 = por %p34_p4, %p33_p1  ;;  %p956_p10 = scmp.eq.s32.totalorder %s767_s13, 1 }
  0x2d   : > { %s123_s18 = sand.u32 1, %s719_s11   ;;  %s500_s24 = sshll.u32 %s723_s12, 7 }
  0x2e   : > { %p837_p12 = por %p956_p10, %p33_p1  ;;  %s499_s25 = sshll.u32 %s123_s18, 3 }
  0x2f   : > { %s846_s27 = scalar_lea.hbm %s946_s0, %s500_s24  ;;  %s127_s19 = scalar_lea.vmem [#allocation2], %s499_s25 }
  0x30   : > { %s134_s22 = sshll.u32 %s127_s19, 4  ;;  %p848_p11 = pnand %p544_p6, %p35_p8  ;;  %s852_s22 = int_to_ptr.vmem [resolvable:$true] %s134_s22 }
  0x31   : > { %s124_s28 = scalar_lea.sflag [#allocation3], %s123_s18  ;;  %s623_s29 = scalar_lea.hbm %s846_s27, 128 }
  0x32   : > { %p624_p13 = scmp.ne.s32.totalorder %s846_s27, %s623_s29  ;;  %p625_p0 = pneg %p848_p11 }
  0x33   : > { %s628_s4 = scalar_lea.hbm %s946_s0, 256  ;;  %p629_p7 = scmp.lt.u32.totalorder %s846_s27, %s946_s0 }
  0x34   : > { %p626_p3 = pnand %p625_p0, %p624_p13  ;;  %p630_p9 = scmp.lt.u32.totalorder %s628_s4, %s623_s29 }
  0x35   : > { %p632_p1 = scmp.lt.u32.totalorder %s623_s29, %s846_s27 }
  0x36   : > { %p627_p5 = pneg %p626_p3  ;;  %p631_p2 = por %p630_p9, %p629_p7 }
  0x38   : > { %p633_p4 = por %p632_p1, %p631_p2 }
  0x3a   : > { %p634_p6 = pnand %p633_p4, %p627_p5 }
  0x3c   : > { %637 = shalt.err (!%p634_p6)
}
  0x3d   : > { %s638_s7 = scalar_lea.vmem %s852_s22, 128  ;;  %s728_s18 = smov [#allocation2]  }
  0x3e   : > { %p639_p8 = scmp.ne.s32.totalorder %s852_s22, %s638_s7  ;;  %s643_s24 = sshll.u32 %s728_s18, 4  ;;  %s644_s24 = int_to_ptr.vmem [resolvable:$false] %s643_s24 }
  0x3f   : > { %s645_s25 = scalar_lea.vmem %s644_s24, 256  ;;  %p646_p3 = scmp.lt.s32.totalorder %s852_s22, %s644_s24 }
  0x40   : > { %p641_p10 = pnand %p639_p8, %p625_p0  ;;  %p647_p7 = scmp.lt.s32.totalorder %s645_s25, %s638_s7 }
  0x42   : > { %p642_p13 = pneg %p641_p10  ;;  %p648_p9 = por %p647_p7, %p646_p3 }
  0x44   : > { %p649_p2 = pnand %p648_p9, %p642_p13 }
  0x46   : > { %652 = shalt.err (!%p649_p2)
}
  0x47   : > { %538 = dma.hbm_to_vmem [thread:$0]  (!%p848_p11), %s846_s27, 128, %s852_s22, %s124_s28  }
  0x48   : > { %p959_p5 = scmp.ne.s32.totalorder %s954_s17, 0 }
  0x49   : > { %s882_s20 = sand.u32 (!%p959_p5), 1, %s715_s10   ;;  %p960_p0 = scmp.ne.s32.totalorder (!%p959_p5), %s952_s15, 0 }
  0x4a   : > { %143 = sbr.rel (%p959_p5) target bundleno = 558 (0x22e), region = 28  ;;  %s502_s26 = sshll.u32 (!%p959_p5), %s882_s20, 3 }
  0x4b   : > { %s146_s19 = scalar_lea.sflag (!%p959_p5), [#allocation3], %s882_s20  ;;  %s149_s29 = scalar_lea.vmem (!%p959_p5), [#allocation2], %s502_s26 }
  0x51   : > { %698 = dma.done.wait (%p960_p0), %s146_s19, 128  }
  0x52   : > { %700 = vsyncadd (%p960_p0), %s146_s19, 4294967168  ;;  %p961_p11 = scmp.eq.s32.totalorder %s767_s13, 0 }
  0x54   : > { %702 = dma.done.wait (%p961_p11), [#allocation6], 1024   ;;  %p962_p1 = pmov %p961_p11 }
  0x55   : > { %v729_v0 = vmov 0   ;;  %v583_v1 = vld [vmem:[#allocation5 + $0x4] ss:$16 sps:$4 sm:$0xff]   ;;  %v585_v2 = vld [vmem:[#allocation5] ss:$16 sps:$4 sm:$0xff]   ;;  %vm225_vm0 = vcmask 261120  }
  0x56   : > { %704 = vsyncadd (%p962_p1), [#allocation6], 4294966272  ;;  %261 = vmatprep.mubr.bf16.mxu1 %v729_v0  ;;  %229 = vmatprep.subr.bf16.mxu1 %v583_v1  ;;  %v586_v3 = vld [vmem:[#allocation5 + $0x24] ss:$16 sps:$4 sm:$0xff]   ;;  %v588_v4 = vld [vmem:[#allocation5 + $0x20] ss:$16 sps:$4 sm:$0xff]  }
  0x57   : > { %230 = vmatpush1.bf16.msra.mxu1 %v585_v2  ;;  %v175_v5 = vld [vmem:[%s149_s29] sm:$0xff]  ;;  %s516_s15 = sshll.u32 %s767_s13, 7  ;;  %s173_s17 = scalar_lea.vmem [#allocation7], %s502_s26  ;;  %vm399_vm1 = vcmask 64512  }
  0x58   : > { %231 = vmatprep.subr.bf16.mxu1 %v586_v3  ;;  %v591_v6 = vld [vmem:[#allocation5 + $0xc] ss:$16 sps:$4 sm:$0xff]   ;;  %v176_v7 = vpack.c.bf16 %v175_v5, %v175_v5  ;;  %v589_v8 = vld [vmem:[#allocation5 + $0x8] ss:$16 sps:$4 sm:$0xff]   ;;  %s415_s27 = sshll.u32 %s173_s17, 4  ;;  %s902_s28 = scalar_lea.hbm %s948_s2, %s516_s15  ;;  %s904_s27 = int_to_ptr.vmem [resolvable:$true] %s415_s27 }
  0x59   : > { %v594_v9 = vld [vmem:[#allocation5 + $0x2c] ss:$16 sps:$4 sm:$0xff]   ;;  %v592_v10 = vld [vmem:[#allocation5 + $0x28] ss:$16 sps:$4 sm:$0xff]   ;;  %s402_s30 = scalar_lea.sflag [#allocation4], %s882_s20  ;;  %s653_s13 = scalar_lea.vmem %s904_s27, 128 }
  0x5a   : > { %p654_p4 = scmp.ne.s32.totalorder %s904_s27, %s653_s13  ;;  %s730_s3 = smov [#allocation7]  }
  0x5b   : > { %232 = vmatpush1.bf16.msra.mxu1 %v588_v4  ;;  %s657_s4 = sshll.u32 %s730_s3, 4  ;;  %s658_s4 = int_to_ptr.vmem [resolvable:$false] %s657_s4 }
  0x5c   : > { %270 = vmatprep.subr.bf16.mxu1 %v591_v6  ;;  %p655_p6 = pnand %p654_p4, %p837_p12  ;;  %s659_s5 = scalar_lea.vmem %s658_s4, 256 }
  0x5d   : > { %p660_p10 = scmp.lt.s32.totalorder %s904_s27, %s658_s4  ;;  %p661_p13 = scmp.lt.s32.totalorder %s659_s5, %s653_s13 }
  0x5e   : > { %513 = vmatmul.mubr.msk.bf16.vlgmr.msra.gmra.mrb[0].mxu1 %vm225_vm0, %v176_v7  ;;  %p656_p8 = pneg %p655_p6 }
  0x5f   : > { %271 = vmatpush1.bf16.msra.mxu1 %v589_v8  ;;  %302 = vmatprep.mubr.bf16.mxu1 %v729_v0  ;;  %p662_p3 = por %p661_p13, %p660_p10 }
  0x60   : > { %272 = vmatprep.subr.bf16.mxu1 %v594_v9 }
  0x61   : > { %p663_p7 = pnand %p662_p3, %p656_p8 }
  0x63   : > { %273 = vmatpush1.bf16.msra.mxu1 %v592_v10 }
  0x66   : > { %514 = vmatmul.mubr.msk.bf16.vlgmr.msra.gmra.mrb[4].mxu1 %vm225_vm0, %v176_v7 }
 0x131   : > { %v263_v11 = vpop.f32.mrb[0].mxu1 }
 0x132   : > { %v311_v12 = vmax.f32 %v263_v11, 0.0  ;;  %v265_v13 = vpop.f32.mrb[1].mxu1 }
 0x133   : > { %v312_v14 = vmax.f32 %v265_v13, 0.0  ;;  %v267_v15 = vpop.f32.mrb[2].mxu1 }
 0x134   : > { %v268_v16 = vpop.f32.mrb[3].mxu1  ;;  %v315_v18 = vpack.c.bf16 %v311_v12, %v311_v12 }
 0x135   : > { %v316_v17 = vpack.c.bf16 %v312_v14, %v312_v14 }
 0x137   : > { %319 = vmatprep.subr.bf16.mxu0 %v316_v17  ;;  %351 = vmatprep.mubr.bf16.mxu0 %v316_v17 }
 0x138   : > { %320 = vmatpush1.bf16.xpose.msra.mxu0 %v315_v18 }
 0x139   : > { %v304_v19 = vpop.f32.mrb[4].mxu1 }
 0x13a   : > { %v313_v20 = vmax.f32 %v304_v19, 0.0  ;;  %v306_v21 = vpop.f32.mrb[5].mxu1 }
 0x13b   : > { %v314_v22 = vmax.f32 %v306_v21, 0.0  ;;  %v308_v23 = vpop.f32.mrb[6].mxu1 }
 0x13c   : > { %v317_v24 = vpack.c.bf16 %v313_v20, %v313_v20  ;;  %v309_v25 = vpop.f32.mrb[7].mxu1 }
 0x13d   : > { %v318_v26 = vpack.c.bf16 %v314_v22, %v314_v22 }
 0x13f   : > { %352 = vmatmul.mubr.bf16.vlgmr.msra.gmra.mrb[0].mxu0 %v315_v18  ;;  %359 = vmatprep.subr.bf16.mxu0 %v318_v26 }
 0x140   : > { %360 = vmatpush1.bf16.xpose.msra.mxu0 %v317_v24  ;;  %391 = vmatprep.mubr.bf16.mxu0 %v318_v26 }
 0x14b   : > { %392 = vmatmul.mubr.bf16.vlgmr.msra.gmra.mrb[0].mxu0 %v317_v24 }
 0x21e   : > { %v393_v27 = vpop.f32.mrb[0].mxu0 }
 0x21f   : > { %400 = vst.msk [vmem:[%s173_s17] sm:$0xff] %vm399_vm1, %v393_v27  ;;  %v395_v28 = vpop.f32.mrb[1].mxu0 }
 0x220   : > { %v396_v29 = vpop.f32.mrb[2].mxu0 }
 0x221   : > { %666 = shalt.err (!%p663_p7)
}
 0x222   : > { %s667_s6 = scalar_lea.hbm %s902_s28, 128  ;;  %s671_s24 = scalar_lea.hbm %s948_s2, 256 }
 0x223   : > { %p668_p9 = scmp.ne.s32.totalorder %s902_s28, %s667_s6  ;;  %p672_p0 = scmp.lt.u32.totalorder %s902_s28, %s948_s2 }
 0x224   : > { %p673_p11 = scmp.lt.u32.totalorder %s671_s24, %s667_s6  ;;  %p675_p4 = scmp.lt.u32.totalorder %s667_s6, %s902_s28 }
 0x225   : > { %p669_p2 = pnand %p668_p9, %p837_p12 }
 0x226   : > { %p674_p1 = por %p673_p11, %p672_p0 }
 0x227   : > { %p670_p5 = pneg %p669_p2 }
 0x228   : > { %p676_p6 = por %p675_p4, %p674_p1 }
 0x22a   : > { %p677_p8 = pnand %p676_p6, %p670_p5 }
 0x22c   : > { %680 = shalt.err (!%p677_p8)
}
 0x22d   : > { %529 = dma.vmem_to_hbm [thread:$0]  (%p837_p12), %s904_s27, 128, %s902_s28, %s402_s30   ;;  %v397_v30 = vpop.f32.mrb[3].mxu0 }
 0x22e PF: > { %s427_s26 = sand.u32 1, %s711_s9   ;;  %p963_p10 = scmp.ne.s32.totalorder %s953_s16, 0 }
 0x22f   : > { %p964_p13 = scmp.ge.s32.totalorder %s723_s12, 2  ;;  %s428_s19 = scalar_lea.sflag [#allocation4], %s427_s26 }
 0x231   : > { %p540_p3 = pnand %p964_p13, %p963_p10 }
 0x233   : > { %706 = dma.done.wait (!%p540_p3), %s428_s19, 128  }
 0x234   : > { %708 = vsyncadd (!%p540_p3), %s428_s19, 4294967168  ;;  %p16_p7 = scmp.ge.s32.totalorder %s802_s21, 4   ;;  %s965_s9 = smov %s715_s10 }
 0x235   : > { %s966_s10 = smov %s719_s11  ;;  %s967_s11 = smov %s833_s8 }
 0x236   : > { %s968_s12 = smov %s802_s21  ;;  %18 = sbr.rel (!%p16_p7) target bundleno = 6 (0x6), region = 77 }
 0x23d   :  { %433 = vsyncpa [#allocation3], 1 }
 0x23e   :  { %435 = vsyncpa [#allocation3 + $0x1], 1 }
 0x23f   :  { %436 = vsyncpa [#allocation6], 1 }
 0x240   :  { %437 = vsyncpa [#allocation4], 1 }
 0x241   :  { %439 = vsyncpa [#allocation4 + $0x1], 1 }

</bundles_post_ra>
